<compile_context>
chip_gen: v5e
topology: v5e:2x2
jax: 0.10.0
libtpu: 0.0.40
codegen_flags: <defaults>
</compile_context>

<pallas_src>
import math

import jax
import jax.numpy as jnp
from jax import lax
from jax.experimental import pallas as pl
from jax.experimental.pallas import tpu as pltpu

_VMEM_LIMIT_BYTES = 40 * 1024 * 1024      # explicit; fits v7x 64 MiB with headroom
_RESIDENT_H_BYTES = 8 * 1024 * 1024       # keep h resident in stage 2 below this


def _round_up(x, m):
    return ((x + m - 1) // m) * m


def _pad_n(n):
    n128 = _round_up(n, 128)
    if n128 <= 512:
        return n128                        # small graph: full-dim / halved blocks
    return _round_up(n, 512)               # large graph: always 512-aligned tiles


def _row_tile(n_pad):
    # Prefer 512-row blocks; for smaller graphs split in two so both
    # TensorCores (v7x megacore) get work on the leading "parallel" axis.
    if n_pad >= 1024:
        return 512
    if n_pad >= 256:
        return n_pad // 2                  # multiple of 64 -> sublane-aligned
    return n_pad


def _k_tile(n_pad):
    # Wide K blocks for adj streaming (amortize per-grid-step overhead).
    if n_pad <= 2048:
        return n_pad
    for t in (2048, 1024, 512):
        if n_pad % t == 0:
            return t
    return 512                             # unreachable given 512-aligned padding


def _col_tile(n_pad):
    # Lane-dense stage-2 output columns (unmasked vst, big writeback DMAs).
    if n_pad < 1024:
        return n_pad
    return 1024 if n_pad % 1024 == 0 else 512


# --------------- Stage 1: h = relu(adj @ support + b), row-tiled -------------

def _gcn_relu_kernel(adj_ref, sup_ref, b_ref, h_ref, acc_ref):
    k = pl.program_id(1)

    @pl.when(k == 0)
    def _():
        acc_ref[...] = jnp.zeros_like(acc_ref)

    # (TM, TK) @ (TK, nhid_pad) -> f32 accumulation on the MXU.
    acc_ref[...] += jnp.dot(adj_ref[...], sup_ref[...],
                            preferred_element_type=jnp.float32)

    @pl.when(k == pl.num_programs(1) - 1)
    def _():
        h_ref[...] = jnp.maximum(acc_ref[...] + b_ref[...], jnp.float32(0.0))


# --------------- Forward wrapper ---------------------------------------------

def structure_decoder_forward(x, adj, weight, bias):
    """Structure_Decoder forward (eval mode) as two tiled Pallas kernels.

    x:      [N, nhid] float32
    adj:    [N, N]    float32 (dense adjacency; torch.spmm handled densely)
    weight: [nhid, nhid] float32
    bias:   [nhid]    float32
    returns [N, N]    float32
    """
    n, nhid = x.shape
    assert adj.shape == (n, n)
    assert weight.shape == (nhid, nhid)
    assert bias.shape == (nhid,)

    x = x.astype(jnp.float32)
    adj = adj.astype(jnp.float32)
    weight = weight.astype(jnp.float32)
    bias = bias.astype(jnp.float32)

    n_pad = _pad_n(n)
    nhid_pad = _round_up(nhid, 128)

    # Pad nhid to a lane-dense multiple of 128. Exact: padded h columns are
    # relu(0 + 0) = 0 and contribute 0 to h @ h.T.
    if nhid_pad != nhid:
        w_p = jnp.zeros((nhid, nhid_pad), jnp.float32).at[:, :nhid].set(weight)
        b_p = jnp.zeros((nhid_pad,), jnp.float32).at[:nhid].set(bias)
    else:
        w_p, b_p = weight, bias

    # Only materialize a padded copy of adj / x when n is not tile-aligned.
    if n_pad != n:
        adj_p = jnp.zeros((n_pad, n_pad), jnp.float32).at[:n, :n].set(adj)
        x_p = jnp.zeros((n_pad, nhid), jnp.float32).at[:n, :].set(x)
    else:
        adj_p, x_p = adj, x

    # support = x @ W is a tiny GEMM; compute it once, not per row-tile.
    support = jnp.dot(x_p, w_p, preferred_element_type=jnp.float32)
    bias2d = b_p.reshape(1, nhid_pad)

    tm = _row_tile(n_pad)
    tk = _k_tile(n_pad)
    grid_m = n_pad // tm
    grid_k = n_pad // tk

    # ---- Stage 1: h = relu(adj @ support + b) ----
    h = pl.pallas_call(
        _gcn_relu_kernel,
        out_shape=jax.ShapeDtypeStruct((n_pad, nhid_pad), jnp.float32),
        grid_spec=pltpu.PrefetchScalarGridSpec(
            num_scalar_prefetch=0,
            grid=(grid_m, grid_k),
            in_specs=[
                pl.BlockSpec((tm, tk), lambda i, k: (i, k)),        # adj block
                pl.BlockSpec((tk, nhid_pad), lambda i, k: (k, 0)),  # support slab
                pl.BlockSpec((1, nhid_pad), lambda i, k: (0, 0)),   # bias (resident)
            ],
            out_specs=pl.BlockSpec((tm, nhid_pad), lambda i, k: (i, 0)),
            scratch_shapes=[pltpu.VMEM((tm, nhid_pad), jnp.float32)],
        ),
        compiler_params=pltpu.CompilerParams(
            dimension_semantics=("parallel", "arbitrary"),
            vmem_limit_bytes=_VMEM_LIMIT_BYTES,
        ),
        cost_estimate=pl.CostEstimate(
            flops=2 * n_pad * n_pad * nhid_pad,
            transcendentals=0,
            bytes_accessed=4 * (n_pad * n_pad + 2 * n_pad * nhid_pad + nhid_pad),
        ),
    )(adj_p, support, bias2d)

    # TODO(synk): training-mode dropout (F.dropout, training=True) not applied;
    # inference/eval semantics (identity) are used here.

    # ---- Stage 2: out = h @ h.T ----
    tm2 = _row_tile(n_pad)
    tn2 = _col_tile(n_pad)
    grid_m2 = n_pad // tm2
    grid_n2 = n_pad // tn2

    resident = (n_pad * nhid_pad * 4) <= _RESIDENT_H_BYTES

    if resident:
        # h's j-operand stays VMEM-resident (constant block index -> DMA'd
        # once); slice the needed row strip inside the kernel.
        def _gram_kernel(hi_ref, hall_ref, out_ref):
            j = pl.program_id(1)
            start = pl.multiple_of(j * tn2, 128)
            hj = hall_ref[pl.ds(start, tn2), :]
            out_ref[...] = lax.dot_general(
                hi_ref[...], hj,
                dimension_numbers=(((1,), (1,)), ((), ())),
                preferred_element_type=jnp.float32)

        hj_spec = pl.BlockSpec((n_pad, nhid_pad), lambda i, j: (0, 0))
    else:
        def _gram_kernel(hi_ref, hj_ref, out_ref):
            out_ref[...] = lax.dot_general(
                hi_ref[...], hj_ref[...],
                dimension_numbers=(((1,), (1,)), ((), ())),
                preferred_element_type=jnp.float32)

        hj_spec = pl.BlockSpec((tn2, nhid_pad), lambda i, j: (j, 0))

    out_p = pl.pallas_call(
        _gram_kernel,
        out_shape=jax.ShapeDtypeStruct((n_pad, n_pad), jnp.float32),
        grid_spec=pltpu.PrefetchScalarGridSpec(
            num_scalar_prefetch=0,
            grid=(grid_m2, grid_n2),
            in_specs=[
                pl.BlockSpec((tm2, nhid_pad), lambda i, j: (i, 0)),  # h row block
                hj_spec,                                             # h "col" source
            ],
            out_specs=pl.BlockSpec((tm2, tn2), lambda i, j: (i, j)),
        ),
        compiler_params=pltpu.CompilerParams(
            dimension_semantics=("parallel", "parallel"),
            vmem_limit_bytes=_VMEM_LIMIT_BYTES,
        ),
        cost_estimate=pl.CostEstimate(
            flops=2 * n_pad * n_pad * nhid_pad,
            transcendentals=0,
            bytes_accessed=4 * (n_pad * n_pad + 2 * n_pad * nhid_pad),
        ),
    )(h, h)

    if n_pad != n:
        return out_p[:n, :n]
    return out_p


def _reference_forward(x, adj, weight, bias):
    support = x @ weight
    h = adj @ support + bias
    h = jnp.maximum(h, 0.0)
    return h @ h.T


def _make_inputs(key, n, nhid):
    kx, kadj, kw, kb = jax.random.split(key, 4)
    x = jax.random.normal(kx, (n, nhid), dtype=jnp.float32)
    a = jax.random.uniform(kadj, (n, n), dtype=jnp.float32)
    adj = (a + a.T) * 0.5 / n
    # GraphConvolution init: uniform(-stdv, stdv), stdv = 1/sqrt(out_features).
    stdv = 1.0 / math.sqrt(nhid)
    weight = jax.random.uniform(kw, (nhid, nhid), dtype=jnp.float32,
                                minval=-stdv, maxval=stdv)
    bias = jax.random.uniform(kb, (nhid,), dtype=jnp.float32,
                              minval=-stdv, maxval=stdv)
    return x, adj, weight, bias


if __name__ == "__main__":
    NHID = 32
    DROPOUT = 0.3  # unused at inference (eval mode)
    key = jax.random.PRNGKey(0)

    # Case 1: tile-aligned N (no adj padding copy), single row block.
    # Case 2: ragged N (exercises padding path + grid_m >= 2 split).
    for case_key, n_nodes in zip(jax.random.split(key, 2), (64, 200)):
        x, adj, weight, bias = _make_inputs(case_key, n_nodes, NHID)

        out = structure_decoder_forward(x, adj, weight, bias)
        out = jax.block_until_ready(out)

        ref = _reference_forward(x, adj, weight, bias)
        assert out.shape == (n_nodes, n_nodes)
        assert jnp.allclose(out, ref, atol=1e-3, rtol=1e-3), (
            f"mismatch vs reference for N={n_nodes}")

    print("KERNEL_OK")
</pallas_src>

<mosaic_0001>
module attributes {stable_mosaic.version = 11 : i64} {
  func.func @_gcn_relu_kernel(%arg0: i32, %arg1: i32, %arg2: memref<128x128xf32, #tpu.memory_space<vmem>>, %arg3: memref<128x128xf32, #tpu.memory_space<vmem>>, %arg4: memref<1x128xf32, #tpu.memory_space<vmem>>, %arg5: memref<128x128xf32, #tpu.memory_space<vmem>>, %arg6: memref<128x128xf32, #tpu.memory_space<vmem>>) attributes {dimension_semantics = [#tpu.dimension_semantics<parallel>, #tpu.dimension_semantics<arbitrary>], iteration_bounds = array<i64: 1, 1>, scalar_prefetch = 0 : i64, scratch_operands = 1 : i64, tpu.core_type = #tpu.core_type<tc>, window_params = [{transform_indices = @transform_0, window_bounds = array<i64: 128, 128>}, {transform_indices = @transform_1, window_bounds = array<i64: 128, 128>}, {pipeline_mode = #tpu.pipeline_mode<synchronous>, transform_indices = @transform_2, window_bounds = array<i64: 1, 128>}, {transform_indices = @transform_3, window_bounds = array<i64: 128, 128>}]} {
    %c0_i32 = arith.constant 0 : i32
    %0 = arith.cmpi eq, %arg1, %c0_i32 : i32
    %1 = arith.extui %0 : i1 to i32
    %c0_i32_0 = arith.constant 0 : i32
    %2 = arith.cmpi ne, %1, %c0_i32_0 : i32
    scf.if %2 {
      %cst_10 = arith.constant 0.000000e+00 : f32
      %12 = vector.broadcast %cst_10 : f32 to vector<128x128xf32>
      %c0_11 = arith.constant 0 : index
      %c0_12 = arith.constant 0 : index
      %13 = vector.load %arg6[%c0_11, %c0_12] : memref<128x128xf32, #tpu.memory_space<vmem>>, vector<128x128xf32>
      tpu.vector_store %arg6[%c0_11, %c0_12], %12 {strides = array<i32>} : memref<128x128xf32, #tpu.memory_space<vmem>>, vector<128x128xf32>,
    } else {
    }
    %c0 = arith.constant 0 : index
    %c0_1 = arith.constant 0 : index
    %3 = vector.load %arg6[%c0, %c0_1] : memref<128x128xf32, #tpu.memory_space<vmem>>, vector<128x128xf32>
    %c0_2 = arith.constant 0 : index
    %c0_3 = arith.constant 0 : index
    %4 = vector.load %arg2[%c0_2, %c0_3] : memref<128x128xf32, #tpu.memory_space<vmem>>, vector<128x128xf32>
    %c0_4 = arith.constant 0 : index
    %c0_5 = arith.constant 0 : index
    %5 = vector.load %arg3[%c0_4, %c0_5] : memref<128x128xf32, #tpu.memory_space<vmem>>, vector<128x128xf32>
    %cst = arith.constant dense<0.000000e+00> : vector<128x128xf32>
    %6 = tpu.matmul %4, %5, %cst {dimension_numbers = #tpu.dot_dimension_numbers<[1], [0], [0], [1], [0, 0, 1, 1], [], []>} : vector<128x128xf32>, vector<128x128xf32>, vector<128x128xf32> -> vector<128x128xf32>
    %7 = arith.addf %3, %6 : vector<128x128xf32>
    %c0_6 = arith.constant 0 : index
    %c0_7 = arith.constant 0 : index
    %8 = vector.load %arg6[%c0_6, %c0_7] : memref<128x128xf32, #tpu.memory_space<vmem>>, vector<128x128xf32>
    tpu.vector_store %arg6[%c0_6, %c0_7], %7 {strides = array<i32>} : memref<128x128xf32, #tpu.memory_space<vmem>>, vector<128x128xf32>,
    %c0_i32_8 = arith.constant 0 : i32
    %9 = arith.cmpi eq, %arg1, %c0_i32_8 : i32
    %10 = arith.extui %9 : i1 to i32
    %c0_i32_9 = arith.constant 0 : i32
    %11 = arith.cmpi ne, %10, %c0_i32_9 : i32
    scf.if %11 {
      %c0_10 = arith.constant 0 : index
      %c0_11 = arith.constant 0 : index
      %12 = vector.load %arg6[%c0_10, %c0_11] : memref<128x128xf32, #tpu.memory_space<vmem>>, vector<128x128xf32>
      %c0_12 = arith.constant 0 : index
      %c0_13 = arith.constant 0 : index
      %13 = vector.load %arg4[%c0_12, %c0_13] : memref<1x128xf32, #tpu.memory_space<vmem>>, vector<1x128xf32>
      %14 = vector.broadcast %13 : vector<1x128xf32> to vector<128x128xf32>
      %15 = arith.addf %12, %14 : vector<128x128xf32>
      %cst_14 = arith.constant 0.000000e+00 : f32
      %16 = vector.broadcast %cst_14 : f32 to vector<128x128xf32>
      %17 = arith.maximumf %15, %16 : vector<128x128xf32>
      %c0_15 = arith.constant 0 : index
      %c0_16 = arith.constant 0 : index
      %18 = vector.load %arg5[%c0_15, %c0_16] : memref<128x128xf32, #tpu.memory_space<vmem>>, vector<128x128xf32>
      tpu.vector_store %arg5[%c0_15, %c0_16], %17 {strides = array<i32>} : memref<128x128xf32, #tpu.memory_space<vmem>>, vector<128x128xf32>,
    } else {
    }
    return
  }
  func.func @transform_0(%arg0: i32, %arg1: i32) -> (i32, i32) {
    %c0_i32 = arith.constant 0 : i32
    return %arg0, %arg1 : i32, i32
  }
  func.func @transform_1(%arg0: i32, %arg1: i32) -> (i32, i32) {
    %c0_i32 = arith.constant 0 : i32
    %c0_i32_0 = arith.constant 0 : i32
    return %arg1, %c0_i32 : i32, i32
  }
  func.func @transform_2(%arg0: i32, %arg1: i32) -> (i32, i32) {
    %c0_i32 = arith.constant 0 : i32
    %c0_i32_0 = arith.constant 0 : i32
    %c0_i32_1 = arith.constant 0 : i32
    return %c0_i32, %c0_i32_0 : i32, i32
  }
  func.func @transform_3(%arg0: i32, %arg1: i32) -> (i32, i32) {
    %c0_i32 = arith.constant 0 : i32
    %c0_i32_0 = arith.constant 0 : i32
    return %arg0, %c0_i32 : i32, i32
  }
}

</mosaic_0001>

<bundles_post_ra>
// kernel: tpu_custom_call.1
= control target key start
LH: loop header
LB: loop body
LE: loop exit
PB: predicated region body
PF: predicated region fallthrough
CT: control target
= control target key end

     0   :  { %8 = vsyncpa [#allocation4], 0  ;;  %s481_s0 = inlined_call_operand.hbm [shape: f32[128,128], index: 0, kind: input, shape index: {}]   ;;  %s482_s1 = inlined_call_operand.hbm [shape: f32[128,128], index: 1, kind: input, shape index: {}]   ;;  %s483_s2 = inlined_call_operand.vmem [shape: f32[1,128], index: 2, kind: input, shape index: {}]   ;;  %s484_s3 = inlined_call_operand.hbm [shape: f32[128,128], index: 3, kind: output, shape index: {}]  }
   0x1   :  { %9 = vsyncpa [#allocation7], 0 }
   0x2   :  { %10 = vsyncpa [#allocation5], 0  ;;  %s15_s14 = sshll.u32 %s481_s0, 4  ;;  %s435_s15 = smov [#allocation3]   ;;  %s16_s14 = int_to_ptr.hbm [resolvable:$true] %s15_s14 }
   0x3   :  { %s17_s16 = sshll.u32 %s435_s15, 4  ;;  %s28_s19 = sshll.u32 %s482_s1, 4  ;;  %s18_s16 = int_to_ptr.vmem [resolvable:$true] %s17_s16  ;;  %s29_s19 = int_to_ptr.hbm [resolvable:$true] %s28_s19 }
   0x4   :  { %s436_s20 = smov 128   ;;  %s437_s21 = smov 8  }
   0x5   :  { %23 = dma.hbm_to_vmem [thread:$0]  %s16_s14, 2048, %s18_s16, [#allocation4], %s436_s20, %s436_s20, %s437_s21  }
   0x6   :  { %s438_s22 = smov [#allocation6]  }
   0x7   :  { %s30_s23 = sshll.u32 %s438_s22, 4  ;;  %s31_s23 = int_to_ptr.vmem [resolvable:$true] %s30_s23 }
   0x8   :  { %36 = dma.hbm_to_vmem [thread:$0]  %s29_s19, 2048, %s31_s23, [#allocation7], %s436_s20, %s436_s20, %s437_s21  }
   0x9   :  { %429 = dma.done.wait [#allocation4], 2048  }
   0xa   :  { %430 = vsyncadd [#allocation4], 4294965248 }
   0xb   :  { %431 = dma.done.wait [#allocation7], 2048  }
   0xc   :  { %432 = vsyncadd [#allocation7], 4294965248  ;;  %v114_v0 = vld [vmem:[#allocation6 + $0x78] sm:$0xff]  ;;  %v113_v1 = vld [vmem:[#allocation6 + $0x70] sm:$0xff]  ;;  %s289_s27 = sshll.u32 %s484_s3, 4  ;;  %s290_s27 = int_to_ptr.hbm [resolvable:$true] %s289_s27 }
   0xd   :  { %304 = vmatpush.msra.mxu2 %v114_v0  ;;  %305 = vmatpush.msra.mxu3 %v114_v0  ;;  %v112_v2 = vld [vmem:[#allocation6 + $0x68] sm:$0xff]  ;;  %v111_v3 = vld [vmem:[#allocation6 + $0x60] sm:$0xff]  ;;  %v110_v4 = vld [vmem:[#allocation6 + $0x58] sm:$0xff] }
   0xe   :  { %115 = vmatpush.msra.mxu0 %v114_v0  ;;  %303 = vmatpush.msra.mxu1 %v114_v0  ;;  %v109_v5 = vld [vmem:[#allocation6 + $0x50] sm:$0xff]  ;;  %v108_v6 = vld [vmem:[#allocation6 + $0x48] sm:$0xff]  ;;  %v107_v7 = vld [vmem:[#allocation6 + $0x40] sm:$0xff] }
   0xf   :  { %307 = vmatpush.msra.mxu2 %v113_v1  ;;  %308 = vmatpush.msra.mxu3 %v113_v1  ;;  %v106_v8 = vld [vmem:[#allocation6 + $0x38] sm:$0xff]  ;;  %v105_v9 = vld [vmem:[#allocation6 + $0x30] sm:$0xff]  ;;  %v104_v10 = vld [vmem:[#allocation6 + $0x28] sm:$0xff] }
  0x10   :  { %116 = vmatpush.msra.mxu0 %v113_v1  ;;  %306 = vmatpush.msra.mxu1 %v113_v1  ;;  %v103_v11 = vld [vmem:[#allocation6 + $0x20] sm:$0xff]  ;;  %v102_v12 = vld [vmem:[#allocation6 + $0x18] sm:$0xff]  ;;  %v101_v13 = vld [vmem:[#allocation6 + $0x10] sm:$0xff] }
  0x11   :  { %310 = vmatpush.msra.mxu2 %v112_v2  ;;  %311 = vmatpush.msra.mxu3 %v112_v2  ;;  %v100_v14 = vld [vmem:[#allocation6 + $0x8] sm:$0xff]  ;;  %v99_v15 = vld [vmem:[#allocation6] sm:$0xff]  ;;  %v93_v24 = vld [vmem:[#allocation3 + $0x50] sm:$0xff] }
  0x12   :  { %117 = vmatpush.msra.mxu0 %v112_v2  ;;  %309 = vmatpush.msra.mxu1 %v112_v2  ;;  %v91_v16 = vld [vmem:[#allocation3 + $0x40] sm:$0xff]  ;;  %v92_v20 = vld [vmem:[#allocation3 + $0x48] sm:$0xff]  ;;  %v97_v25 = vld [vmem:[#allocation3 + $0x70] sm:$0xff] }
  0x13   :  { %313 = vmatpush.msra.mxu2 %v111_v3  ;;  %314 = vmatpush.msra.mxu3 %v111_v3  ;;  %v95_v17 = vld [vmem:[#allocation3 + $0x60] sm:$0xff]  ;;  %v96_v21 = vld [vmem:[#allocation3 + $0x68] sm:$0xff]  ;;  %v85_v26 = vld [vmem:[#allocation3 + $0x10] sm:$0xff] }
  0x14   :  { %118 = vmatpush.msra.mxu0 %v111_v3  ;;  %312 = vmatpush.msra.mxu1 %v111_v3  ;;  %v83_v18 = vld [vmem:[#allocation3] sm:$0xff]  ;;  %v84_v22 = vld [vmem:[#allocation3 + $0x8] sm:$0xff]  ;;  %v89_v27 = vld [vmem:[#allocation3 + $0x30] sm:$0xff] }
  0x15   :  { %316 = vmatpush.msra.mxu2 %v110_v4  ;;  %317 = vmatpush.msra.mxu3 %v110_v4  ;;  %v87_v19 = vld [vmem:[#allocation3 + $0x20] sm:$0xff]  ;;  %v88_v23 = vld [vmem:[#allocation3 + $0x28] sm:$0xff]  ;;  %v94_v28 = vld [vmem:[#allocation3 + $0x58] sm:$0xff] }
  0x16   :  { %119 = vmatpush.msra.mxu0 %v110_v4  ;;  %315 = vmatpush.msra.mxu1 %v110_v4  ;;  %v98_v29 = vld [vmem:[#allocation3 + $0x78] sm:$0xff]  ;;  %v356_v32 = vld [vmem:[%s483_s2] ss:$0 sm:$0xff]  ;;  %s439_s2 = smov [#allocation8]  }
  0x17   :  { %319 = vmatpush.msra.mxu2 %v109_v5  ;;  %320 = vmatpush.msra.mxu3 %v109_v5  ;;  %v86_v30 = vld [vmem:[#allocation3 + $0x18] sm:$0xff]  ;;  %s287_s24 = sshll.u32 %s439_s2, 4  ;;  %s288_s24 = int_to_ptr.vmem [resolvable:$true] %s287_s24 }
  0x18   :  { %120 = vmatpush.msra.mxu0 %v109_v5  ;;  %318 = vmatpush.msra.mxu1 %v109_v5  ;;  %v90_v31 = vld [vmem:[#allocation3 + $0x38] sm:$0xff] }
  0x19   :  { %322 = vmatpush.msra.mxu2 %v108_v6  ;;  %323 = vmatpush.msra.mxu3 %v108_v6 }
  0x1a   :  { %121 = vmatpush.msra.mxu0 %v108_v6  ;;  %321 = vmatpush.msra.mxu1 %v108_v6 }
  0x1b   :  { %325 = vmatpush.msra.mxu2 %v107_v7  ;;  %326 = vmatpush.msra.mxu3 %v107_v7 }
  0x1c   :  { %122 = vmatpush.msra.mxu0 %v107_v7  ;;  %324 = vmatpush.msra.mxu1 %v107_v7 }
  0x1d   :  { %328 = vmatpush.msra.mxu2 %v106_v8  ;;  %329 = vmatpush.msra.mxu3 %v106_v8 }
  0x1e   :  { %123 = vmatpush.msra.mxu0 %v106_v8  ;;  %327 = vmatpush.msra.mxu1 %v106_v8 }
  0x1f   :  { %331 = vmatpush.msra.mxu2 %v105_v9  ;;  %332 = vmatpush.msra.mxu3 %v105_v9 }
  0x20   :  { %124 = vmatpush.msra.mxu0 %v105_v9  ;;  %330 = vmatpush.msra.mxu1 %v105_v9 }
  0x21   :  { %334 = vmatpush.msra.mxu2 %v104_v10  ;;  %335 = vmatpush.msra.mxu3 %v104_v10 }
  0x22   :  { %125 = vmatpush.msra.mxu0 %v104_v10  ;;  %333 = vmatpush.msra.mxu1 %v104_v10 }
  0x23   :  { %337 = vmatpush.msra.mxu2 %v103_v11  ;;  %338 = vmatpush.msra.mxu3 %v103_v11 }
  0x24   :  { %126 = vmatpush.msra.mxu0 %v103_v11  ;;  %336 = vmatpush.msra.mxu1 %v103_v11 }
  0x25   :  { %340 = vmatpush.msra.mxu2 %v102_v12  ;;  %341 = vmatpush.msra.mxu3 %v102_v12 }
  0x26   :  { %127 = vmatpush.msra.mxu0 %v102_v12  ;;  %339 = vmatpush.msra.mxu1 %v102_v12 }
  0x27   :  { %343 = vmatpush.msra.mxu2 %v101_v13  ;;  %344 = vmatpush.msra.mxu3 %v101_v13 }
  0x28   :  { %128 = vmatpush.msra.mxu0 %v101_v13  ;;  %342 = vmatpush.msra.mxu1 %v101_v13 }
  0x29   :  { %346 = vmatpush.msra.mxu2 %v100_v14  ;;  %347 = vmatpush.msra.mxu3 %v100_v14 }
  0x2a   :  { %129 = vmatpush.msra.mxu0 %v100_v14  ;;  %345 = vmatpush.msra.mxu1 %v100_v14 }
  0x2b   :  { %349 = vmatpush.msra.mxu2 %v99_v15  ;;  %350 = vmatpush.msra.mxu3 %v99_v15 }
  0x2c   :  { %155 = vmatmul.f32.vlgmr.msra.gmra.mxu2 %v91_v16  ;;  %167 = vmatmul.f32.vlgmr.msra.gmra.mxu3 %v95_v17 }
  0x2d   :  { %130 = vmatpush.msra.mxu0 %v99_v15  ;;  %348 = vmatpush.msra.mxu1 %v99_v15 }
  0x2e   :  { %131 = vmatmul.f32.vlgmr.msra.gmra.mxu0 %v83_v18  ;;  %143 = vmatmul.f32.vlgmr.msra.gmra.mxu1 %v87_v19 }
  0x34   :  { %158 = vmatmul.f32.gmra.mxu2 %v92_v20  ;;  %170 = vmatmul.f32.gmra.mxu3 %v96_v21 }
  0x36   :  { %134 = vmatmul.f32.gmra.mxu0 %v84_v22  ;;  %146 = vmatmul.f32.gmra.mxu1 %v88_v23 }
  0x3c   :  { %161 = vmatmul.f32.gmra.mxu2 %v93_v24  ;;  %173 = vmatmul.f32.gmra.mxu3 %v97_v25 }
  0x3e   :  { %137 = vmatmul.f32.gmra.mxu0 %v85_v26  ;;  %149 = vmatmul.f32.gmra.mxu1 %v89_v27 }
  0x44   :  { %164 = vmatmul.f32.gmra.mxu2 %v94_v28  ;;  %176 = vmatmul.f32.gmra.mxu3 %v98_v29 }
  0x46   :  { %140 = vmatmul.f32.gmra.mxu0 %v86_v30  ;;  %152 = vmatmul.f32.gmra.mxu1 %v90_v31 }
  0xab   :  { %v132_v33 = vpop.f32.mrf.mxu0  ;;  %v144_v34 = vpop.f32.mrf.mxu1 }
  0xac   :  { %v235_v35 = vadd.f32 %v356_v32, %v132_v33  ;;  %v239_v36 = vadd.f32 %v356_v32, %v144_v34 }
  0xae   :  { %v251_v37 = vmax.f32 %v235_v35, 0.0  ;;  %v255_v38 = vmax.f32 %v239_v36, 0.0 }
  0xaf   :  { %v156_v39 = vpop.f32.mrf.mxu2  ;;  %v168_v40 = vpop.f32.mrf.mxu3 }
  0xb0   :  { %267 = vst [vmem:[#allocation8] sm:$0xff] %v251_v37  ;;  %v243_v41 = vadd.f32 %v356_v32, %v156_v39  ;;  %v247_v42 = vadd.f32 %v356_v32, %v168_v40 }
  0xb1   :  { %271 = vst [vmem:[#allocation8 + $0x20] sm:$0xff] %v255_v38 }
  0xb2   :  { %v259_v43 = vmax.f32 %v243_v41, 0.0  ;;  %v263_v44 = vmax.f32 %v247_v42, 0.0 }
  0xb3   :  { %v135_v45 = vpop.f32.mrf.mxu0  ;;  %v147_v46 = vpop.f32.mrf.mxu1 }
  0xb4   :  { %275 = vst [vmem:[#allocation8 + $0x40] sm:$0xff] %v259_v43  ;;  %v236_v47 = vadd.f32 %v356_v32, %v135_v45  ;;  %v240_v48 = vadd.f32 %v356_v32, %v147_v46 }
  0xb5   :  { %279 = vst [vmem:[#allocation8 + $0x60] sm:$0xff] %v263_v44 }
  0xb6   :  { %v252_v49 = vmax.f32 %v236_v47, 0.0  ;;  %v256_v50 = vmax.f32 %v240_v48, 0.0 }
  0xb7   :  { %v159_v51 = vpop.f32.mrf.mxu2  ;;  %v171_v52 = vpop.f32.mrf.mxu3 }
  0xb8   :  { %268 = vst [vmem:[#allocation8 + $0x8] sm:$0xff] %v252_v49  ;;  %v244_v53 = vadd.f32 %v356_v32, %v159_v51  ;;  %v248_v54 = vadd.f32 %v356_v32, %v171_v52 }
  0xb9   :  { %272 = vst [vmem:[#allocation8 + $0x28] sm:$0xff] %v256_v50 }
  0xba   :  { %v260_v55 = vmax.f32 %v244_v53, 0.0  ;;  %v264_v56 = vmax.f32 %v248_v54, 0.0 }
  0xbb   :  { %v138_v57 = vpop.f32.mrf.mxu0  ;;  %v150_v58 = vpop.f32.mrf.mxu1 }
  0xbc   :  { %276 = vst [vmem:[#allocation8 + $0x48] sm:$0xff] %v260_v55  ;;  %v237_v59 = vadd.f32 %v356_v32, %v138_v57  ;;  %v241_v60 = vadd.f32 %v356_v32, %v150_v58 }
  0xbd   :  { %280 = vst [vmem:[#allocation8 + $0x68] sm:$0xff] %v264_v56 }
  0xbe   :  { %v253_v61 = vmax.f32 %v237_v59, 0.0  ;;  %v257_v62 = vmax.f32 %v241_v60, 0.0 }
  0xbf   :  { %v162_v63 = vpop.f32.mrf.mxu2  ;;  %v174_v0 = vpop.f32.mrf.mxu3 }
  0xc0   :  { %269 = vst [vmem:[#allocation8 + $0x10] sm:$0xff] %v253_v61  ;;  %v245_v1 = vadd.f32 %v356_v32, %v162_v63  ;;  %v249_v2 = vadd.f32 %v356_v32, %v174_v0 }
  0xc1   :  { %273 = vst [vmem:[#allocation8 + $0x30] sm:$0xff] %v257_v62 }
  0xc2   :  { %v261_v3 = vmax.f32 %v245_v1, 0.0  ;;  %v265_v4 = vmax.f32 %v249_v2, 0.0 }
  0xc3   :  { %v141_v5 = vpop.f32.mrf.mxu0  ;;  %v153_v6 = vpop.f32.mrf.mxu1 }
  0xc4   :  { %277 = vst [vmem:[#allocation8 + $0x50] sm:$0xff] %v261_v3  ;;  %v238_v7 = vadd.f32 %v356_v32, %v141_v5  ;;  %v242_v8 = vadd.f32 %v356_v32, %v153_v6 }
  0xc5   :  { %281 = vst [vmem:[#allocation8 + $0x70] sm:$0xff] %v265_v4 }
  0xc6   :  { %v254_v9 = vmax.f32 %v238_v7, 0.0  ;;  %v258_v10 = vmax.f32 %v242_v8, 0.0 }
  0xc7   :  { %v165_v11 = vpop.f32.mrf.mxu2  ;;  %v177_v12 = vpop.f32.mrf.mxu3 }
  0xc8   :  { %270 = vst [vmem:[#allocation8 + $0x18] sm:$0xff] %v254_v9  ;;  %v246_v13 = vadd.f32 %v356_v32, %v165_v11  ;;  %v250_v14 = vadd.f32 %v356_v32, %v177_v12 }
  0xc9   :  { %274 = vst [vmem:[#allocation8 + $0x38] sm:$0xff] %v258_v10 }
  0xca   :  { %v262_v15 = vmax.f32 %v246_v13, 0.0  ;;  %v266_v16 = vmax.f32 %v250_v14, 0.0 }
  0xcc   :  { %278 = vst [vmem:[#allocation8 + $0x58] sm:$0xff] %v262_v15 }
  0xcd   :  { %282 = vst [vmem:[#allocation8 + $0x78] sm:$0xff] %v266_v16 }
  0xce   :  { %295 = dma.vmem_to_hbm [thread:$0]  %s288_s24, 2048, %s290_s27, [#allocation5], %s436_s20, %s436_s20, %s437_s21  }
  0xcf   :  { %433 = dma.done.wait [#allocation5], 2048  }
  0xd0   :  { %434 = vsyncadd [#allocation5], 4294965248 }
  0xd1   :  { %300 = vsyncpa [#allocation4], 1 }
  0xd2   :  { %301 = vsyncpa [#allocation7], 1 }
  0xd3   :  { %302 = vsyncpa [#allocation5], 1 }

</bundles_post_ra>
